<compile_context>
chip_gen: v6e
topology: v6e:2x2x1
jax: 0.10.0
libtpu: 0.0.40
codegen_flags: <defaults>
</compile_context>

<pallas_src>
import functools

import jax
import jax.numpy as jnp
import numpy as np
from jax import lax
from jax.experimental import pallas as pl
from jax.experimental.pallas import tpu as pltpu

NODE_NUM = 77  # forced by nn.Linear(77, 77) in the PyTorch module


def _round_up(v, m):
    return ((v + m - 1) // m) * m


def _prep_kernel(e_ref, wl_ref, bl_ref, wp_ref, bp_ref,
                 sup_ref, w_ref, bias_ref, *, cheb_k):
    # e: (N, D); wl: (N, N) torch Linear weight (out x in); bl: (1, N)
    # wp: (D, K*I*O) flattened weights_pool; bp: (D, O)
    # outputs: sup (K, N, N) f32, w (N, K*I*O) f32, bias (N, O) f32
    e = e_ref[...]
    n = e.shape[0]

    # supports = softmax(relu(Linear(E @ E^T)), axis=1)
    a = lax.dot_general(e, e, (((1,), (1,)), ((), ())),
                        preferred_element_type=jnp.float32)          # E @ E^T
    l = lax.dot_general(a, wl_ref[...], (((1,), (1,)), ((), ())),
                        preferred_element_type=jnp.float32)          # A @ W^T
    l = jnp.maximum(l + bl_ref[...], 0.0)                            # + bias, relu
    m = jnp.max(l, axis=1, keepdims=True)
    p = jnp.exp(l - m)
    s = p * pl.reciprocal(jnp.sum(p, axis=1, keepdims=True), approx=False)

    row = lax.broadcasted_iota(jnp.int32, (n, n), 0)
    col = lax.broadcasted_iota(jnp.int32, (n, n), 1)
    eye = (row == col).astype(jnp.float32)

    sup_ref[0] = eye
    sup_ref[1] = s
    prev2, prev1 = eye, s
    for k in range(2, cheb_k):
        cur = 2.0 * jnp.dot(s, prev1, preferred_element_type=jnp.float32) - prev2
        sup_ref[k] = cur
        prev2, prev1 = prev1, cur

    # Batch-invariant per-node weights / bias: single lane-dense MXU dots.
    w_ref[...] = jnp.dot(e, wp_ref[...], preferred_element_type=jnp.float32)     # (N, K*I*O)
    bias_ref[...] = jnp.dot(e, bp_ref[...], preferred_element_type=jnp.float32)  # (N, O)


def _gconv_kernel(sup_ref, w_ref, bias_ref, x_ref, out_ref, xg_ref,
                  *, cheb_k, dim_in, node_chunk):
    # sup : (K*NP, NP) bf16   k-stacked supports (resident)
    # w   : (NP, K*I*O) f32   per-node weights, lane-dense columns (resident)
    # bias: (NP, O) f32       (resident)
    # x   : (I, NP, TB) bf16  batch tile, batch on the lane axis
    # out : (NP, O, TB) f32   batch tile, lane-dense stores
    # xg  : (I, K*NP, TB) f32 VMEM scratch for the MXU phase
    kk, ii, nc = cheb_k, dim_in, node_chunk
    n_pad, o_dim, tb = out_ref.shape

    # ---- phase 1 (MXU): one k-stacked dot per input channel ----------------
    # xg[i, k*NP + n, b] = sum_m S_k[n, m] * x[b, m, i]
    s_all = sup_ref[...]                                   # (K*NP, NP) bf16
    for i in range(ii):
        xg_ref[i] = jnp.dot(s_all, x_ref[i],
                            preferred_element_type=jnp.float32)

    # ---- phase 2 (VPU): node-chunked, register-resident accumulator --------
    for c in range(n_pad // nc):
        r0 = c * nc
        # acc[n, o, b], initialized with the broadcast bias (saves one pass).
        acc = jnp.broadcast_to(
            bias_ref[pl.ds(r0, nc), :][:, :, None], (nc, o_dim, tb))
        for k in range(kk):
            for i in range(ii):
                xg = xg_ref[i, pl.ds(k * n_pad + r0, nc), :]          # (nc, TB)
                wk = w_ref[pl.ds(r0, nc),
                           pl.ds((k * ii + i) * o_dim, o_dim)]        # (nc, O)
                # acc[n, o, b] += w[n, o] * xg[n, b]   (VPU FMA, lane-dense)
                acc = acc + wk[:, :, None] * xg[:, None, :]
        out_ref[pl.ds(r0, nc), :, :] = acc


def agl_forward(x, node_embeddings, weights_pool, bias_pool, w_lin, b_lin,
                cheb_k, *, batch_tile=256, node_chunk=8):
    N, D = node_embeddings.shape
    B, _, I = x.shape
    O = bias_pool.shape[1]
    K = cheb_k
    KIO = K * I * O
    assert K >= 2, "cheb_k must be >= 2 (as required by the PyTorch module)"

    # ---- Kernel 1: batch-invariant precompute (single program, tiny shapes) ----
    wpool_flat = weights_pool.reshape(D, KIO)       # column index = (k*I + i)*O + o
    supports, w_node, bias = pl.pallas_call(
        functools.partial(_prep_kernel, cheb_k=K),
        out_shape=(
            jax.ShapeDtypeStruct((K, N, N), jnp.float32),
            jax.ShapeDtypeStruct((N, KIO), jnp.float32),
            jax.ShapeDtypeStruct((N, O), jnp.float32),
        ),
    )(node_embeddings, w_lin, b_lin.reshape(1, N), wpool_flat, bias_pool)

    # ---- pad node dim, stack k, cast MXU operands to bf16 ----
    NP = _round_up(N, 16)                           # 77 -> 80 (bf16 sublane tile)
    assert NP % node_chunk == 0
    sup_p = jnp.pad(supports, ((0, 0), (0, NP - N), (0, NP - N)))
    sup_p = sup_p.reshape(K * NP, NP).astype(jnp.bfloat16)
    w_p = jnp.pad(w_node, ((0, NP - N), (0, 0)))
    bias_p = jnp.pad(bias, ((0, NP - N), (0, 0)))

    # ---- batch tiling: >=128 lanes (dense stores), >=2 grid steps if possible ----
    bp0 = _round_up(max(B, 1), 128)
    half = _round_up((bp0 + 1) // 2, 128)           # keep both v7x TCs busy
    tb = max(128, min(batch_tile, half))
    bp = _round_up(bp0, tb)

    # Fold batch onto the lane axis: x (B, N, I) -> (I, NP, BP), zero padded.
    # TODO(synk): producing x in (I,N,B) / consuming out in (N,O,B) upstream
    # would remove these two wrapper-side HBM transpose passes.
    x_f = jnp.transpose(x, (2, 1, 0))
    x_f = jnp.pad(x_f, ((0, 0), (0, NP - N), (0, bp - B))).astype(jnp.bfloat16)

    # ---- Kernel 2: graph convolution over batch tiles ----
    out_t = pl.pallas_call(
        functools.partial(_gconv_kernel, cheb_k=K, dim_in=I,
                          node_chunk=node_chunk),
        out_shape=jax.ShapeDtypeStruct((NP, O, bp), jnp.float32),
        grid=(bp // tb,),
        in_specs=[
            pl.BlockSpec((K * NP, NP), lambda t: (0, 0)),    # supports (resident)
            pl.BlockSpec((NP, KIO), lambda t: (0, 0)),       # node weights (resident)
            pl.BlockSpec((NP, O), lambda t: (0, 0)),         # node bias (resident)
            pl.BlockSpec((I, NP, tb), lambda t: (0, 0, t)),  # x batch tile
        ],
        out_specs=pl.BlockSpec((NP, O, tb), lambda t: (0, 0, t)),
        scratch_shapes=[pltpu.VMEM((I, K * NP, tb), jnp.float32)],
        compiler_params=pltpu.CompilerParams(dimension_semantics=("parallel",)),
    )(sup_p, w_p, bias_p, x_f)

    # (NP, O, BP) -> (B, N, O)
    return jnp.transpose(out_t, (2, 0, 1))[:B, :N, :]


def agl_reference(x, e, wpool, bpool, w_lin, b_lin, cheb_k):
    """Pure-JAX mirror of the PyTorch forward (for validation)."""
    N = e.shape[0]
    a = e @ e.T
    l = a @ w_lin.T + b_lin
    supports = jax.nn.softmax(jnp.maximum(l, 0.0), axis=1)
    support_set = [jnp.eye(N, dtype=jnp.float32), supports]
    for _ in range(2, cheb_k):
        support_set.append(2.0 * supports @ support_set[-1] - support_set[-2])
    sup = jnp.stack(support_set, axis=0)
    weights = jnp.einsum('nd,dkio->nkio', e, wpool)
    bias = e @ bpool
    x_g = jnp.einsum('knm,bmc->bknc', sup, x)
    x_g = jnp.transpose(x_g, (0, 2, 1, 3))
    return jnp.einsum('bnki,nkio->bno', x_g, weights) + bias


if __name__ == "__main__":
    # Small, deterministic config (N is pinned to 77 by the module definition).
    B, N, dim_in, dim_out, cheb_k, embed_dim = 2, NODE_NUM, 4, 8, 3, 10

    key = jax.random.PRNGKey(0)
    k_x, k_e, k_wp, k_bp, k_wl, k_bl = jax.random.split(key, 6)

    x = jax.random.normal(k_x, (B, N, dim_in), dtype=jnp.float32)
    node_embeddings = 0.3 * jax.random.normal(k_e, (N, embed_dim), dtype=jnp.float32)
    weights_pool = 0.3 * jax.random.normal(k_wp, (embed_dim, cheb_k, dim_in, dim_out),
                                           dtype=jnp.float32)
    bias_pool = 0.3 * jax.random.normal(k_bp, (embed_dim, dim_out), dtype=jnp.float32)
    w_lin = 0.2 * jax.random.normal(k_wl, (N, N), dtype=jnp.float32)   # Linear(77,77).weight
    b_lin = 0.1 * jax.random.normal(k_bl, (N,), dtype=jnp.float32)     # Linear(77,77).bias

    out = agl_forward(x, node_embeddings, weights_pool, bias_pool, w_lin, b_lin, cheb_k)
    out = jax.block_until_ready(out)

    with jax.default_matmul_precision("highest"):
        ref = agl_reference(x, node_embeddings, weights_pool, bias_pool, w_lin, b_lin, cheb_k)
    ref = jax.block_until_ready(ref)

    assert out.shape == (B, N, dim_out), out.shape
    # supports / x enter the MXU as bf16 (accumulation stays f32 via
    # preferred_element_type), so use a 2e-2 tolerance vs. the highest-precision
    # f32 reference.
    np.testing.assert_allclose(np.asarray(out), np.asarray(ref), rtol=2e-2, atol=2e-2)

    print("KERNEL_OK")
</pallas_src>

<mosaic_0001>
module attributes {stable_mosaic.version = 11 : i64} {
  func.func @_prep_kernel(%arg0: memref<77x10xf32, #tpu.memory_space<vmem>>, %arg1: memref<77x77xf32, #tpu.memory_space<vmem>>, %arg2: memref<1x77xf32, #tpu.memory_space<vmem>>, %arg3: memref<10x96xf32, #tpu.memory_space<vmem>>, %arg4: memref<10x8xf32, #tpu.memory_space<vmem>>, %arg5: memref<3x77x77xf32, #tpu.memory_space<vmem>>, %arg6: memref<77x96xf32, #tpu.memory_space<vmem>>, %arg7: memref<77x8xf32, #tpu.memory_space<vmem>>) attributes {dimension_semantics = [], scalar_prefetch = 0 : i64, scratch_operands = 0 : i64, tpu.core_type = #tpu.core_type<tc>} {
    %c0 = arith.constant 0 : index
    %c0_0 = arith.constant 0 : index
    %0 = vector.load %arg0[%c0, %c0_0] : memref<77x10xf32, #tpu.memory_space<vmem>>, vector<77x10xf32>
    %cst = arith.constant dense<0.000000e+00> : vector<77x77xf32>
    %1 = tpu.matmul %0, %0, %cst {dimension_numbers = #tpu.dot_dimension_numbers<[1], [1], [0], [0], [0, 0, 1, 0], [], []>} : vector<77x10xf32>, vector<77x10xf32>, vector<77x77xf32> -> vector<77x77xf32>
    %c0_1 = arith.constant 0 : index
    %c0_2 = arith.constant 0 : index
    %2 = vector.load %arg1[%c0_1, %c0_2] : memref<77x77xf32, #tpu.memory_space<vmem>>, vector<77x77xf32>
    %cst_3 = arith.constant dense<0.000000e+00> : vector<77x77xf32>
    %3 = tpu.matmul %1, %2, %cst_3 {dimension_numbers = #tpu.dot_dimension_numbers<[1], [1], [0], [0], [0, 0, 1, 0], [], []>} : vector<77x77xf32>, vector<77x77xf32>, vector<77x77xf32> -> vector<77x77xf32>
    %c0_4 = arith.constant 0 : index
    %c0_5 = arith.constant 0 : index
    %4 = vector.load %arg2[%c0_4, %c0_5] : memref<1x77xf32, #tpu.memory_space<vmem>>, vector<1x77xf32>
    %5 = vector.broadcast %4 : vector<1x77xf32> to vector<77x77xf32>
    %6 = arith.addf %3, %5 : vector<77x77xf32>
    %cst_6 = arith.constant 0.000000e+00 : f32
    %7 = vector.broadcast %cst_6 : f32 to vector<77x77xf32>
    %8 = arith.maximumf %6, %7 : vector<77x77xf32>
    %cst_7 = arith.constant dense<0xFF800000> : vector<77xf32>
    %9 = vector.multi_reduction <maximumf>, %8, %cst_7 [1] : vector<77x77xf32> to vector<77xf32>
    %10 = vector.shape_cast %9 : vector<77xf32> to vector<77x1xf32>
    %11 = vector.broadcast %10 : vector<77x1xf32> to vector<77x77xf32>
    %12 = arith.subf %8, %11 : vector<77x77xf32>
    %13 = math.exp %12 : vector<77x77xf32>
    %cst_8 = arith.constant dense<0.000000e+00> : vector<77xf32>
    %14 = vector.multi_reduction <add>, %13, %cst_8 [1] : vector<77x77xf32> to vector<77xf32>
    %15 = vector.shape_cast %14 : vector<77xf32> to vector<77x1xf32>
    %16 = tpu.reciprocal %15 : vector<77x1xf32> -> vector<77x1xf32>
    %17 = vector.broadcast %16 : vector<77x1xf32> to vector<77x77xf32>
    %18 = arith.mulf %13, %17 : vector<77x77xf32>
    %19 = tpu.iota {dimensions = array<i32: 0>} : vector<77x77xi32>
    %20 = tpu.iota {dimensions = array<i32: 1>} : vector<77x77xi32>
    %21 = arith.cmpi eq, %19, %20 : vector<77x77xi32>
    %22 = arith.extui %21 : vector<77x77xi1> to vector<77x77xi32>
    %23 = arith.sitofp %22 : vector<77x77xi32> to vector<77x77xf32>
    %c0_9 = arith.constant 0 : index
    %c0_10 = arith.constant 0 : index
    %c0_11 = arith.constant 0 : index
    %24 = vector.load %arg5[%c0_9, %c0_10, %c0_11] : memref<3x77x77xf32, #tpu.memory_space<vmem>>, vector<1x77x77xf32>
    %25 = vector.shape_cast %24 : vector<1x77x77xf32> to vector<77x77xf32>
    %26 = vector.shape_cast %23 : vector<77x77xf32> to vector<1x77x77xf32>
    tpu.vector_store %arg5[%c0_9, %c0_10, %c0_11], %26 {strides = array<i32>} : memref<3x77x77xf32, #tpu.memory_space<vmem>>, vector<1x77x77xf32>,
    %c1 = arith.constant 1 : index
    %c0_12 = arith.constant 0 : index
    %c0_13 = arith.constant 0 : index
    %27 = vector.load %arg5[%c1, %c0_12, %c0_13] : memref<3x77x77xf32, #tpu.memory_space<vmem>>, vector<1x77x77xf32>
    %28 = vector.shape_cast %27 : vector<1x77x77xf32> to vector<77x77xf32>
    %29 = vector.shape_cast %18 : vector<77x77xf32> to vector<1x77x77xf32>
    tpu.vector_store %arg5[%c1, %c0_12, %c0_13], %29 {strides = array<i32>} : memref<3x77x77xf32, #tpu.memory_space<vmem>>, vector<1x77x77xf32>,
    %cst_14 = arith.constant dense<0.000000e+00> : vector<77x77xf32>
    %30 = tpu.matmul %18, %18, %cst_14 {dimension_numbers = #tpu.dot_dimension_numbers<[1], [0], [0], [1], [0, 0, 1, 1], [], []>} : vector<77x77xf32>, vector<77x77xf32>, vector<77x77xf32> -> vector<77x77xf32>
    %cst_15 = arith.constant 2.000000e+00 : f32
    %31 = vector.broadcast %cst_15 : f32 to vector<77x77xf32>
    %32 = arith.mulf %31, %30 : vector<77x77xf32>
    %33 = arith.subf %32, %23 : vector<77x77xf32>
    %c2 = arith.constant 2 : index
    %c0_16 = arith.constant 0 : index
    %c0_17 = arith.constant 0 : index
    %34 = vector.load %arg5[%c2, %c0_16, %c0_17] : memref<3x77x77xf32, #tpu.memory_space<vmem>>, vector<1x77x77xf32>
    %35 = vector.shape_cast %34 : vector<1x77x77xf32> to vector<77x77xf32>
    %36 = vector.shape_cast %33 : vector<77x77xf32> to vector<1x77x77xf32>
    tpu.vector_store %arg5[%c2, %c0_16, %c0_17], %36 {strides = array<i32>} : memref<3x77x77xf32, #tpu.memory_space<vmem>>, vector<1x77x77xf32>,
    %c0_18 = arith.constant 0 : index
    %c0_19 = arith.constant 0 : index
    %37 = vector.load %arg3[%c0_18, %c0_19] : memref<10x96xf32, #tpu.memory_space<vmem>>, vector<10x96xf32>
    %cst_20 = arith.constant dense<0.000000e+00> : vector<77x96xf32>
    %38 = tpu.matmul %0, %37, %cst_20 {dimension_numbers = #tpu.dot_dimension_numbers<[1], [0], [0], [1], [0, 0, 1, 1], [], []>} : vector<77x10xf32>, vector<10x96xf32>, vector<77x96xf32> -> vector<77x96xf32>
    %c0_21 = arith.constant 0 : index
    %c0_22 = arith.constant 0 : index
    %39 = vector.load %arg6[%c0_21, %c0_22] : memref<77x96xf32, #tpu.memory_space<vmem>>, vector<77x96xf32>
    tpu.vector_store %arg6[%c0_21, %c0_22], %38 {strides = array<i32>} : memref<77x96xf32, #tpu.memory_space<vmem>>, vector<77x96xf32>,
    %c0_23 = arith.constant 0 : index
    %c0_24 = arith.constant 0 : index
    %40 = vector.load %arg4[%c0_23, %c0_24] : memref<10x8xf32, #tpu.memory_space<vmem>>, vector<10x8xf32>
    %cst_25 = arith.constant dense<0.000000e+00> : vector<77x8xf32>
    %41 = tpu.matmul %0, %40, %cst_25 {dimension_numbers = #tpu.dot_dimension_numbers<[1], [0], [0], [1], [0, 0, 1, 1], [], []>} : vector<77x10xf32>, vector<10x8xf32>, vector<77x8xf32> -> vector<77x8xf32>
    %c0_26 = arith.constant 0 : index
    %c0_27 = arith.constant 0 : index
    %42 = vector.load %arg7[%c0_26, %c0_27] : memref<77x8xf32, #tpu.memory_space<vmem>>, vector<77x8xf32>
    tpu.vector_store %arg7[%c0_26, %c0_27], %41 {strides = array<i32>} : memref<77x8xf32, #tpu.memory_space<vmem>>, vector<77x8xf32>,
    return
  }
}

</mosaic_0001>

<bundles_post_ra>
// kernel: tpu_custom_call.1
= control target key start
LH: loop header
LB: loop body
LE: loop exit
PB: predicated region body
PF: predicated region fallthrough
CT: control target
= control target key end

     0   :  { %13 = vsyncpa [#allocation3], 0  ;;  %vm35_vm0 = vcmask 80896   ;;  %vm198_vm1 = vcmask 629760   ;;  %s1955_s0 = inlined_call_operand.vmem [shape: f32[77,10], index: 0, kind: input, shape index: {}]   ;;  %s1956_s1 = inlined_call_operand.vmem [shape: f32[77,77], index: 1, kind: input, shape index: {}]   ;;  %s1957_s2 = inlined_call_operand.vmem [shape: f32[1,77], index: 2, kind: input, shape index: {}]   ;;  %s1958_s3 = inlined_call_operand.vmem [shape: f32[10,96], index: 3, kind: input, shape index: {}]   ;;  %s1959_s4 = inlined_call_operand.vmem [shape: f32[10,8], index: 4, kind: input, shape index: {}]   ;;  %s1960_s5 = inlined_call_operand.hbm [shape: f32[3,77,77], index: 5, kind: output, shape index: {0}]   ;;  %s1961_s6 = inlined_call_operand.hbm [shape: f32[77,96], index: 6, kind: output, shape index: {1}]   ;;  %s1962_s7 = inlined_call_operand.vmem [shape: f32[77,8], index: 7, kind: output, shape index: {2}]  }
   0x1   :  { %v1507_v0 = vld [vmem:[%s1955_s0 + $0x48] sm:$0x1f]  ;;  %v1512_v1 = vld [vmem:[%s1955_s0 + $0x40] sm:$0xff]  ;;  %v1534_v5 = vld [vmem:[%s1955_s0 + $0x38] sm:$0xff] }
   0x2   :  { %1207 = vmatprep.subr.msk.mxu0 %vm35_vm0, %v1507_v0  ;;  %v1523_v2 = vld [vmem:[%s1955_s0] sm:$0xff]  ;;  %v190_v3 = vld [vmem:[%s1956_s1 + $0x48] sm:$0x1f] }
   0x3   :  { %1208 = vmatpush3.xpose.msk.msra.mxu0 %vm35_vm0, %v1507_v0  ;;  %v189_v4 = vld [vmem:[%s1956_s1 + $0x40] sm:$0xff]  ;;  %1227 = vmatprep.mubr.msk.f32.mxu0 %vm35_vm0, %v1523_v2 }
   0x4   :  { %1209 = vmatprep.subr.msk.mxu0 %vm35_vm0, %v1512_v1  ;;  %1242 = vmatprep.subr.msk.mxu1 %vm198_vm1, %v190_v3 }
   0x5   :  { %1243 = vmatpush3.xpose.msk.msra.mxu1 %vm198_vm1, %v190_v3 }
   0x6   :  { %1244 = vmatprep.subr.msk.mxu1 %vm198_vm1, %v189_v4 }
   0x7   :  { %1210 = vmatpush3.xpose.msk.msra.mxu0 %vm35_vm0, %v1512_v1 }
   0x8   :  { %14 = vsyncpa [#allocation5], 0  ;;  %1211 = vmatprep.subr.msk.mxu0 %vm35_vm0, %v1534_v5  ;;  %v188_v6 = vld [vmem:[%s1956_s1 + $0x38] sm:$0xff]  ;;  %v1551_v7 = vld [vmem:[%s1955_s0 + $0x30] sm:$0xff]  ;;  %vm411_vm2 = vcmask 626688   ;;  %vm589_vm4 = vcmask 1044480  }
   0x9   :  { %1245 = vmatpush3.xpose.msk.msra.mxu1 %vm198_vm1, %v189_v4  ;;  %v187_v8 = vld [vmem:[%s1956_s1 + $0x30] sm:$0xff]  ;;  %v1565_v9 = vld [vmem:[%s1955_s0 + $0x28] sm:$0xff]  ;;  %v1579_v11 = vld [vmem:[%s1955_s0 + $0x20] sm:$0xff]  ;;  %vm740_vm5 = vcmask 1041408   ;;  %vm859_vm15 = vcmask 785408  }
   0xa   :  { %1246 = vmatprep.subr.msk.mxu1 %vm198_vm1, %v188_v6  ;;  %v186_v10 = vld [vmem:[%s1956_s1 + $0x28] sm:$0xff]  ;;  %v185_v12 = vld [vmem:[%s1956_s1 + $0x20] sm:$0xff]  ;;  %v1593_v13 = vld [vmem:[%s1955_s0 + $0x18] sm:$0xff] }
   0xb   :  { %1212 = vmatpush3.xpose.msk.msra.mxu0 %vm35_vm0, %v1534_v5  ;;  %v184_v14 = vld [vmem:[%s1956_s1 + $0x18] sm:$0xff]  ;;  %v1607_v15 = vld [vmem:[%s1955_s0 + $0x10] sm:$0xff]  ;;  %v1621_v17 = vld [vmem:[%s1955_s0 + $0x8] sm:$0xff] }
   0xc   :  { %1213 = vmatprep.subr.msk.mxu0 %vm35_vm0, %v1551_v7  ;;  %v183_v16 = vld [vmem:[%s1956_s1 + $0x10] sm:$0xff]  ;;  %v182_v18 = vld [vmem:[%s1956_s1 + $0x8] sm:$0xff]  ;;  %v181_v19 = vld [vmem:[%s1956_s1] sm:$0xff] }
   0xd   :  { %1247 = vmatpush3.xpose.msk.msra.mxu1 %vm198_vm1, %v188_v6  ;;  %v1059_v36 = vld [vmem:[%s1957_s2] ss:$0 sm:$0xff] }
   0xe   :  { %1248 = vmatprep.subr.msk.mxu1 %vm198_vm1, %v187_v8 }
   0xf   :  { %1214 = vmatpush3.xpose.msk.msra.mxu0 %vm35_vm0, %v1551_v7 }
  0x10   :  { %1215 = vmatprep.subr.msk.mxu0 %vm35_vm0, %v1565_v9 }
  0x11   :  { %1249 = vmatpush3.xpose.msk.msra.mxu1 %vm198_vm1, %v187_v8 }
  0x12   :  { %1250 = vmatprep.subr.msk.mxu1 %vm198_vm1, %v186_v10 }
  0x13   :  { %1216 = vmatpush3.xpose.msk.msra.mxu0 %vm35_vm0, %v1565_v9 }
  0x14   :  { %1217 = vmatprep.subr.msk.mxu0 %vm35_vm0, %v1579_v11 }
  0x15   :  { %1251 = vmatpush3.xpose.msk.msra.mxu1 %vm198_vm1, %v186_v10 }
  0x16   :  { %1252 = vmatprep.subr.msk.mxu1 %vm198_vm1, %v185_v12 }
  0x17   :  { %1218 = vmatpush3.xpose.msk.msra.mxu0 %vm35_vm0, %v1579_v11 }
  0x18   :  { %1219 = vmatprep.subr.msk.mxu0 %vm35_vm0, %v1593_v13 }
  0x19   :  { %1253 = vmatpush3.xpose.msk.msra.mxu1 %vm198_vm1, %v185_v12 }
  0x1a   :  { %1254 = vmatprep.subr.msk.mxu1 %vm198_vm1, %v184_v14 }
  0x1b   :  { %1220 = vmatpush3.xpose.msk.msra.mxu0 %vm35_vm0, %v1593_v13 }
  0x1c   :  { %1221 = vmatprep.subr.msk.mxu0 %vm35_vm0, %v1607_v15 }
  0x1d   :  { %1255 = vmatpush3.xpose.msk.msra.mxu1 %vm198_vm1, %v184_v14 }
  0x1e   :  { %1256 = vmatprep.subr.msk.mxu1 %vm198_vm1, %v183_v16 }
  0x1f   :  { %1222 = vmatpush3.xpose.msk.msra.mxu0 %vm35_vm0, %v1607_v15 }
  0x20   :  { %1223 = vmatprep.subr.msk.mxu0 %vm35_vm0, %v1621_v17 }
  0x21   :  { %1257 = vmatpush3.xpose.msk.msra.mxu1 %vm198_vm1, %v183_v16 }
  0x22   :  { %1258 = vmatprep.subr.msk.mxu1 %vm198_vm1, %v182_v18 }
  0x23   :  { %1224 = vmatpush3.xpose.msk.msra.mxu0 %vm35_vm0, %v1621_v17 }
  0x24   :  { %1225 = vmatprep.subr.msk.mxu0 %vm35_vm0, %v1523_v2 }
  0x25   :  { %1259 = vmatpush3.xpose.msk.msra.mxu1 %vm198_vm1, %v182_v18 }
  0x26   :  { %1260 = vmatprep.subr.msk.mxu1 %vm198_vm1, %v181_v19 }
  0x27   :  { %1226 = vmatpush3.xpose.msk.msra.mxu0 %vm35_vm0, %v1523_v2 }
  0x29   :  { %1261 = vmatpush3.xpose.msk.msra.mxu1 %vm198_vm1, %v181_v19 }
  0x2a   :  { %1228 = vmatmul.mubr.msk.f32.vlgmr.msra.gmra.mxu0 %vm35_vm0, %v1621_v17 }
  0x2b   :  { %1230 = vmatprep.mubr.msk.f32.mxu0 %vm35_vm0, %v1607_v15 }
  0x2e   :  { %1231 = vmatmul.mubr.msk.f32.gmra.mxu0 %vm35_vm0, %v1593_v13 }
  0x2f   :  { %1233 = vmatprep.mubr.msk.f32.mxu0 %vm35_vm0, %v1579_v11 }
  0x32   :  { %1234 = vmatmul.mubr.msk.f32.gmra.mxu0 %vm35_vm0, %v1565_v9 }
  0x33   :  { %1236 = vmatprep.mubr.msk.f32.mxu0 %vm35_vm0, %v1551_v7 }
  0x36   :  { %1237 = vmatmul.mubr.msk.f32.gmra.mxu0 %vm35_vm0, %v1534_v5 }
  0x37   :  { %1239 = vmatprep.mubr.msk.f32.mxu0 %vm35_vm0, %v1512_v1 }
  0x3a   :  { %1240 = vmatmul.mubr.msk.f32.gmra.mxu0 %vm35_vm0, %v1507_v0 }
  0xea   :  { %v1229_v20 = vpop.f32.mrf.mxu0 }
  0xec   :  { %v132_v21 = vpop.f32.mrf.mxu0 }
  0xed   :  { %1262 = vmatprep.mubr.msk.f32.mxu1 %vm198_vm1, %v132_v21 }
  0xee   :  { %v1232_v22 = vpop.f32.mrf.mxu0  ;;  %1263 = vmatmul.mubr.msk.f32.vlgmr.msra.gmra.mxu1 %vm198_vm1, %v1229_v20 }
  0xf0   :  { %v142_v23 = vpop.f32.mrf.mxu0 }
  0xf1   :  { %1265 = vmatprep.mubr.msk.f32.mxu1 %vm198_vm1, %v142_v23 }
  0xf2   :  { %v1235_v24 = vpop.f32.mrf.mxu0  ;;  %1266 = vmatmul.mubr.msk.f32.gmra.mxu1 %vm198_vm1, %v1232_v22 }
  0xf4   :  { %v152_v25 = vpop.f32.mrf.mxu0 }
  0xf5   :  { %1268 = vmatprep.mubr.msk.f32.mxu1 %vm198_vm1, %v152_v25 }
  0xf6   :  { %v1238_v26 = vpop.f32.mrf.mxu0  ;;  %1269 = vmatmul.mubr.msk.f32.gmra.mxu1 %vm198_vm1, %v1235_v24 }
  0xf8   :  { %v162_v27 = vpop.f32.mrf.mxu0 }
  0xf9   :  { %1271 = vmatprep.mubr.msk.f32.mxu1 %vm198_vm1, %v162_v27 }
  0xfa   :  { %v1241_v28 = vpop.f32.mrf.mxu0  ;;  %1272 = vmatmul.mubr.msk.f32.gmra.mxu1 %vm198_vm1, %v1238_v26 }
  0xfc   :  { %v172_v29 = vpop.f32.mrf.mxu0 }
  0xfd   :  { %1274 = vmatprep.mubr.msk.f32.mxu1 %vm198_vm1, %v172_v29 }
  0xfe   :  { %1275 = vmatmul.mubr.msk.f32.gmra.mxu1 %vm198_vm1, %v1241_v28 }
 0x1ae   :  { %v1264_v30 = vpop.f32.mrf.mxu1 }
 0x1af   :  { %v331_v62 = vadd.f32 %v1264_v30, %v1059_v36 }
 0x1b0   :  { %v325_v31 = vpop.f32.mrf.mxu1 }
 0x1b1   :  { %v326_v56 = vadd.f32 %v1059_v36, %v325_v31  ;;  %v375_v8 = vmax.f32 %v331_v62, 0.0 }
 0x1b2   :  { %v1267_v32 = vpop.f32.mrf.mxu1 }
 0x1b3   :  { %v341_v57 = vadd.f32 %v1267_v32, %v1059_v36  ;;  %v374_v63 = vmax.f32 %v326_v56, 0.0  ;;  %v387_v14 = vsel %vm198_vm1, %v375_v8, -inf }
 0x1b4   :  { %v335_v33 = vpop.f32.mrf.mxu1 }
 0x1b5   :  { %v336_v50 = vadd.f32 %v1059_v36, %v335_v33  ;;  %v377_v3 = vmax.f32 %v341_v57, 0.0  ;;  %v384_v10 = vsel %vm198_vm1, %v374_v63, -inf }
 0x1b6   :  { %v1270_v34 = vpop.f32.mrf.mxu1 }
 0x1b7   :  { %v351_v51 = vadd.f32 %v1270_v34, %v1059_v36  ;;  %v376_v58 = vmax.f32 %v336_v50, 0.0  ;;  %v393_v12 = vsel %vm198_vm1, %v377_v3, -inf }
 0x1b8   :  { %v345_v35 = vpop.f32.mrf.mxu1 }
 0x1b9   :  { %v346_v43 = vadd.f32 %v1059_v36, %v345_v35  ;;  %v379_v59 = vmax.f32 %v351_v51, 0.0  ;;  %v390_v4 = vsel %vm198_vm1, %v376_v58, -inf }
 0x1ba   :  { %v1273_v37 = vpop.f32.mrf.mxu1 }
 0x1bb   :  { %v361_v38 = vadd.f32 %v1273_v37, %v1059_v36  ;;  %v378_v52 = vmax.f32 %v346_v43, 0.0  ;;  %v399_v6 = vsel %vm198_vm1, %v379_v59, -inf }
 0x1bc   :  { %v355_v39 = vpop.f32.mrf.mxu1 }
 0x1bd   :  { %v381_v40 = vmax.f32 %v361_v38, 0.0  ;;  %v356_v41 = vadd.f32 %v1059_v36, %v355_v39  ;;  %v396_v60 = vsel %vm198_vm1, %v378_v52, -inf }
 0x1be   :  { %v1276_v42 = vpop.f32.mrf.mxu1 }
 0x1bf   :  { %v380_v44 = vmax.f32 %v356_v41, 0.0  ;;  %v371_v45 = vadd.f32 %v1276_v42, %v1059_v36  ;;  %v405_v46 = vsel %vm198_vm1, %v381_v40, -inf }
 0x1c0   :  { %406 = vmax.xlane.f32.xlu1 %v405_v46  ;;  %v365_v47 = vpop.f32.mrf.mxu1 }
 0x1c1   :  { %v383_v48 = vmax.f32 %v371_v45, 0.0  ;;  %v366_v49 = vadd.f32 %v1059_v36, %v365_v47  ;;  %v402_v54 = vsel %vm198_vm1, %v380_v44, -inf }
 0x1c3   :  { %v382_v53 = vmax.f32 %v366_v49, 0.0  ;;  %v412_v55 = vsel %vm411_vm2, %v383_v48, -inf }
 0x1c4   :  { %403 = vmax.xlane.f32.xlu1 %v402_v54  ;;  %413 = vmax.xlane.f32.xlu0 %v412_v55 }
 0x1c5   :  { %v408_v61 = vsel %vm198_vm1, %v382_v53, -inf }
 0x1c8   :  { %397 = vmax.xlane.f32.xlu1 %v396_v60  ;;  %409 = vmax.xlane.f32.xlu0 %v408_v61 }
 0x1cc   :  { %391 = vmax.xlane.f32.xlu1 %v390_v4  ;;  %400 = vmax.xlane.f32.xlu0 %v399_v6 }
 0x1d0   :  { %385 = vmax.xlane.f32.xlu1 %v384_v10  ;;  %394 = vmax.xlane.f32.xlu0 %v393_v12 }
 0x1d4   :  { %388 = vmax.xlane.f32.xlu0 %v387_v14 }
 0x249   :  { %v407_v16 = vpop.xlane.xlu1 %406 }
 0x24a   :  { %v422_v18 = vsub.f32 %v381_v40, %v407_v16  ;;  %v1459_v16 = vmov 0.0  }
 0x24c   :  { %v439_v23 = vmul.f32 1.442695, %v422_v18 }
 0x24d   :  { %v404_v19 = vpop.xlane.xlu1 %403  ;;  %v414_v20 = vpop.xlane.xlu0 %413 }
 0x24e   :  { %v424_v21 = vsub.f32 %v383_v48, %v414_v20  ;;  %v421_v24 = vsub.f32 %v380_v44, %v404_v19 }
 0x250   :  { %v443_v22 = vmul.f32 1.442695, %v424_v21  ;;  %v437_v29 = vmul.f32 1.442695, %v421_v24 }
 0x251   :  { %v398_v25 = vpop.xlane.xlu1 %397  ;;  %v410_v26 = vpop.xlane.xlu0 %409 }
 0x252   :  { %v423_v27 = vsub.f32 %v382_v53, %v410_v26  ;;  %1375 = vpow2.f32 %v443_v22  ;;  %v419_v30 = vsub.f32 %v378_v52, %v398_v25 }
 0x253   :  { %1377 = vpow2.f32 %v439_v23 }
 0x254   :  { %v441_v28 = vmul.f32 1.442695, %v423_v27  ;;  %v433_v35 = vmul.f32 1.442695, %v419_v30 }
 0x255   :  { %v392_v31 = vpop.xlane.xlu1 %391  ;;  %v401_v32 = vpop.xlane.xlu0 %400 }
 0x256   :  { %v420_v33 = vsub.f32 %v379_v59, %v401_v32  ;;  %1379 = vpow2.f32 %v441_v28  ;;  %v417_v36 = vsub.f32 %v376_v58, %v392_v31 }
 0x257   :  { %1381 = vpow2.f32 %v437_v29 }
 0x258   :  { %v435_v34 = vmul.f32 1.442695, %v420_v33  ;;  %v429_v41 = vmul.f32 1.442695, %v417_v36 }
 0x259   :  { %v395_v37 = vpop.xlane.xlu0 %394  ;;  %v386_v38 = vpop.xlane.xlu1 %385 }
 0x25a   :  { %v418_v39 = vsub.f32 %v377_v3, %v395_v37  ;;  %1383 = vpow2.f32 %v435_v34  ;;  %v415_v42 = vsub.f32 %v374_v63, %v386_v38 }
 0x25b   :  { %1385 = vpow2.f32 %v433_v35 }
 0x25c   :  { %v431_v40 = vmul.f32 1.442695, %v418_v39  ;;  %v425_v47 = vmul.f32 1.442695, %v415_v42 }
 0x25d   :  { %v389_v43 = vpop.xlane.xlu0 %388 }
 0x25e   :  { %v416_v44 = vsub.f32 %v375_v8, %v389_v43  ;;  %1387 = vpow2.f32 %v431_v40  ;;  %v495_v8 = vlaneseq }
 0x25f   :  { %v1376_v45 = vpop.eup %1375  ;;  %1389 = vpow2.f32 %v429_v41 }
 0x260   :  { %v427_v46 = vmul.f32 1.442695, %v416_v44  ;;  %v472_v48 = vsel %vm411_vm2, %v1376_v45, 0.0  ;;  %v1688_v49 = vpop.eup %1377  ;;  %v1724_v10 = vshrl.u32 %v495_v8, 7  ;;  %v1726_v12 = vand.u32 127, %v495_v8 }
 0x261   :  { %473 = vadd.xlane.f32.xlu0 %v472_v48  ;;  %v466_v51 = vsel %vm198_vm1, %v1688_v49, 0.0 }
 0x262   :  { %1391 = vpow2.f32 %v427_v46  ;;  %v497_v14 = vadd.s32 8, %v1724_v10  ;;  %vm508_vm7 = vcmp.eq.s32.totalorder %v1724_v10, %v1726_v12 }
 0x263   :  { %v1690_v50 = vpop.eup %1379  ;;  %1393 = vpow2.f32 %v425_v47 }
 0x264   :  { %v469_v52 = vsel %vm198_vm1, %v1690_v50, 0.0  ;;  %v1696_v53 = vpop.eup %1381  ;;  %vm509_vm3 = vcmp.eq.s32.totalorder %v497_v14, %v1726_v12 }
 0x265   :  { %467 = vadd.xlane.f32.xlu0 %v466_v51  ;;  %470 = vadd.xlane.f32.xlu1 %v469_v52  ;;  %v463_v55 = vsel %vm198_vm1, %v1696_v53, 0.0  ;;  %v1731_v18 = vsel %vm509_vm3, 1.0, %v1459_v16  ;;  %v871_v51 = vld [vmem:[%s1959_s4] sm:$0xff] }
 0x266   :  { %539 = vst.msk [vmem:[#allocation2 + $0x8] sm:$0xff] %vm198_vm1, %v1731_v18  ;;  %v738_v52 = vld [vmem:[%s1958_s3] sm:$0xff] }
 0x267   :  { %v1698_v54 = vpop.eup %1383 }
 0x268   :  { %v460_v56 = vsel %vm198_vm1, %v1698_v54, 0.0  ;;  %v1704_v57 = vpop.eup %1385 }
 0x269   :  { %464 = vadd.xlane.f32.xlu1 %v463_v55  ;;  %461 = vadd.xlane.f32.xlu0 %v460_v56  ;;  %v457_v59 = vsel %vm198_vm1, %v1704_v57, 0.0 }
 0x26b   :  { %v1706_v58 = vpop.eup %1387 }
 0x26c   :  { %v454_v60 = vsel %vm198_vm1, %v1706_v58, 0.0  ;;  %v1712_v61 = vpop.eup %1389 }
 0x26d   :  { %458 = vadd.xlane.f32.xlu1 %v457_v59  ;;  %455 = vadd.xlane.f32.xlu0 %v454_v60  ;;  %v451_v3 = vsel %vm198_vm1, %v1712_v61, 0.0 }
 0x26f   :  { %v1714_v62 = vpop.eup %1391 }
 0x270   :  { %v448_v63 = vsel %vm198_vm1, %v1714_v62, 0.0  ;;  %v1720_v4 = vpop.eup %1393 }
 0x271   :  { %452 = vadd.xlane.f32.xlu1 %v451_v3  ;;  %449 = vadd.xlane.f32.xlu0 %v448_v63  ;;  %v445_v6 = vsel %vm198_vm1, %v1720_v4, 0.0 }
 0x275   :  { %446 = vadd.xlane.f32.xlu1 %v445_v6 }
 0x2ea   :  { %v474_v19 = vpop.xlane.xlu0 %473 }
 0x2eb   :  { %1395 = vrcp.f32 %v474_v19 }
 0x2ee   :  { %v471_v20 = vpop.xlane.xlu1 %470  ;;  %v468_v21 = vpop.xlane.xlu0 %467 }
 0x2ef   :  { %1397 = vrcp.f32 %v471_v20 }
 0x2f0   :  { %1399 = vrcp.f32 %v468_v21 }
 0x2f2   :  { %v465_v22 = vpop.xlane.xlu1 %464  ;;  %v462_v23 = vpop.xlane.xlu0 %461 }
 0x2f3   :  { %1401 = vrcp.f32 %v465_v22 }
 0x2f4   :  { %1403 = vrcp.f32 %v462_v23 }
 0x2f6   :  { %v459_v24 = vpop.xlane.xlu1 %458  ;;  %v456_v25 = vpop.xlane.xlu0 %455 }
 0x2f7   :  { %1405 = vrcp.f32 %v459_v24 }
 0x2f8   :  { %v1396_v26 = vpop.eup %1395  ;;  %1407 = vrcp.f32 %v456_v25 }
 0x2f9   :  { %v1735_v27 = vmul.f32 %v1396_v26, %v1376_v45 }
 0x2fa   :  { %v453_v28 = vpop.xlane.xlu1 %452  ;;  %v450_v29 = vpop.xlane.xlu0 %449 }
 0x2fb   :  { %558 = vst.msk [vmem:[#allocation2 + $0x98] sm:$0x1f] %vm411_vm2, %v1735_v27  ;;  %1409 = vrcp.f32 %v453_v28  ;;  %1277 = vmatprep.subr.msk.mxu0 %vm589_vm4, %v1735_v27  ;;  %1350 = vmatprep.subr.msk.mxu1 %vm589_vm4, %v1735_v27 }
 0x2fc   :  { %v1398_v30 = vpop.eup %1397  ;;  %1411 = vrcp.f32 %v450_v29  ;;  %1278 = vmatpush3.msk.msra.mxu0 %vm589_vm4, %v1735_v27  ;;  %1360 = vmatpush3.msk.msra.mxu1 %vm589_vm4, %v1735_v27 }
 0x2fd   :  { %v1400_v31 = vpop.eup %1399  ;;  %v1744_v32 = vmul.f32 %v1398_v30, %v1690_v50  ;;  %v739_v50 = vld [vmem:[%s1958_s3 + $0x8] sm:$0x3]  ;;  %s1460_s3 = smov [#allocation2]  }
 0x2fe   :  { %v1747_v33 = vmul.f32 %v1400_v31, %v1688_v49  ;;  %v447_v34 = vpop.xlane.xlu1 %446  ;;  %v872_v49 = vld [vmem:[%s1959_s4 + $0x8] sm:$0x3]  ;;  %s1008_s4 = sshll.u32 %s1460_s3, 4  ;;  %s1009_s4 = int_to_ptr.vmem [resolvable:$true] %s1008_s4 }
 0x2ff   :  { %557 = vst.msk [vmem:[#allocation2 + $0x90] sm:$0xff] %vm198_vm1, %v1744_v32  ;;  %1413 = vrcp.f32 %v447_v34  ;;  %1279 = vmatprep.subr.mxu0 %v1744_v32  ;;  %1351 = vmatprep.subr.mxu1 %v1744_v32  ;;  %s1415_s29 = scalar_lea.vmem %s1009_s4, 3840  ;;  %p1420_p1 = scmp.lt.s32.totalorder %s1009_s4, %s1009_s4 }
 0x300   :  { %v1402_v35 = vpop.eup %1401  ;;  %556 = vst.msk [vmem:[#allocation2 + $0x88] sm:$0xff] %vm198_vm1, %v1747_v33  ;;  %1280 = vmatpush3.msra.mxu0 %v1744_v32  ;;  %1361 = vmatpush3.msra.mxu1 %v1744_v32  ;;  %p1416_p0 = scmp.ne.s32.totalorder %s1009_s4, %s1415_s29  ;;  %p1421_p2 = scmp.lt.s32.totalorder %s1415_s29, %s1415_s29 }
 0x301   :  { %v1404_v36 = vpop.eup %1403  ;;  %v491_v37 = vmul.f32 %v1402_v35, %v1696_v53  ;;  %1281 = vmatprep.subr.mxu0 %v1747_v33  ;;  %1352 = vmatprep.subr.mxu1 %v1747_v33 }
 0x302   :  { %v1761_v38 = vmul.f32 %v1404_v36, %v1698_v54  ;;  %1282 = vmatpush3.msra.mxu0 %v1747_v33  ;;  %1362 = vmatpush3.msra.mxu1 %v1747_v33  ;;  %v501_v54 = vadd.s32 40, %v1724_v10  ;;  %p1422_p3 = por %p1421_p2, %p1420_p1 }
 0x303   :  { %555 = vst.msk [vmem:[#allocation2 + $0x80] sm:$0xff] %vm198_vm1, %v491_v37  ;;  %1283 = vmatprep.subr.mxu0 %v491_v37  ;;  %1353 = vmatprep.subr.mxu1 %v491_v37 }
 0x304   :  { %v1406_v39 = vpop.eup %1405  ;;  %554 = vst.msk [vmem:[#allocation2 + $0x78] sm:$0xff] %vm198_vm1, %v1761_v38  ;;  %1306 = vmatprep.mubr.msk.f32.mxu1 %vm198_vm1, %v491_v37  ;;  %1284 = vmatpush3.msra.mxu0 %v491_v37  ;;  %vm513_vm13 = vcmp.eq.s32.totalorder %v501_v54, %v1726_v12  ;;  %p1423_p4 = pnand %p1422_p3, %p1416_p0 }
 0x305   :  { %v1408_v40 = vpop.eup %1407  ;;  %v489_v41 = vmul.f32 %v1406_v39, %v1704_v57  ;;  %1363 = vmatpush3.msra.mxu1 %v491_v37  ;;  %1285 = vmatprep.subr.mxu0 %v1761_v38  ;;  %v500_v57 = vadd.s32 32, %v1724_v10 }
 0x306   :  { %v488_v42 = vmul.f32 %v1408_v40, %v1706_v58  ;;  %1354 = vmatprep.subr.mxu1 %v1761_v38  ;;  %1286 = vmatpush3.msra.mxu0 %v1761_v38  ;;  %v1085_v58 = vsel %vm513_vm13, 1.0, %v1459_v16 }
 0x307   :  { %553 = vst.msk [vmem:[#allocation2 + $0x70] sm:$0xff] %vm198_vm1, %v489_v41  ;;  %1364 = vmatpush3.msra.mxu1 %v1761_v38  ;;  %1287 = vmatprep.subr.mxu0 %v489_v41  ;;  %543 = vst.msk [vmem:[#allocation2 + $0x28] sm:$0xff] %vm198_vm1, %v1085_v58  ;;  %vm512_vm14 = vcmp.eq.s32.totalorder %v500_v57, %v1726_v12 }
 0x308   :  { %v1410_v43 = vpop.eup %1409  ;;  %552 = vst.msk [vmem:[#allocation2 + $0x68] sm:$0xff] %vm198_vm1, %v488_v42  ;;  %1355 = vmatprep.subr.mxu1 %v489_v41  ;;  %1288 = vmatpush3.msra.mxu0 %v489_v41  ;;  %v1084_v59 = vsel %vm512_vm14, 1.0, %v1459_v16 }
 0x309   :  { %v1412_v44 = vpop.eup %1411  ;;  %v487_v45 = vmul.f32 %v1410_v43, %v1712_v61  ;;  %1365 = vmatpush3.msra.mxu1 %v489_v41  ;;  %1289 = vmatprep.subr.mxu0 %v488_v42  ;;  %542 = vst.msk [vmem:[#allocation2 + $0x20] sm:$0xff] %vm198_vm1, %v1084_v59 }
 0x30a   :  { %v486_v46 = vmul.f32 %v1412_v44, %v1714_v62  ;;  %1356 = vmatprep.subr.mxu1 %v488_v42  ;;  %1290 = vmatpush3.msra.mxu0 %v488_v42 }
 0x30b   :  { %551 = vst.msk [vmem:[#allocation2 + $0x60] sm:$0xff] %vm198_vm1, %v487_v45  ;;  %1366 = vmatpush3.msra.mxu1 %v488_v42  ;;  %1291 = vmatprep.subr.mxu0 %v487_v45 }
 0x30c   :  { %v1414_v47 = vpop.eup %1413  ;;  %550 = vst.msk [vmem:[#allocation2 + $0x58] sm:$0xff] %vm198_vm1, %v486_v46  ;;  %1357 = vmatprep.subr.mxu1 %v487_v45  ;;  %1292 = vmatpush3.msra.mxu0 %v487_v45 }
 0x30d   :  { %v485_v48 = vmul.f32 %v1414_v47, %v1720_v4  ;;  %1367 = vmatpush3.msra.mxu1 %v487_v45  ;;  %1293 = vmatprep.subr.mxu0 %v486_v46 }
 0x30e   :  { %1358 = vmatprep.subr.mxu1 %v486_v46  ;;  %1294 = vmatpush3.msra.mxu0 %v486_v46 }
 0x30f   :  { %549 = vst.msk [vmem:[#allocation2 + $0x50] sm:$0xff] %vm198_vm1, %v485_v48  ;;  %1368 = vmatpush3.msra.mxu1 %v486_v46  ;;  %1295 = vmatprep.subr.mxu0 %v485_v48 }
 0x310   :  { %1359 = vmatprep.subr.mxu1 %v485_v48  ;;  %1297 = vmatprep.mubr.msk.f32.mxu0 %vm198_vm1, %v485_v48 }
 0x311   :  { %1296 = vmatpush3.msra.mxu0 %v485_v48  ;;  %1369 = vmatpush3.msra.mxu1 %v485_v48 }
 0x312   :  { %1298 = vmatmul.mubr.msk.f32.vlgmr.msra.gmra.mxu0 %vm198_vm1, %v486_v46  ;;  %1307 = vmatmul.mubr.msk.f32.vlgmr.msra.gmra.mxu1 %vm198_vm1, %v1747_v33 }
 0x313   :  { %1331 = vmatprep.subr.msk.mxu0 %vm740_vm5, %v872_v49  ;;  %1300 = vmatprep.mubr.msk.f32.mxu0 %vm198_vm1, %v487_v45 }
 0x314   :  { %1309 = vmatprep.mubr.msk.f32.mxu1 %vm198_vm1, %v1744_v32  ;;  %1332 = vmatpush3.msk.msra.mxu0 %vm740_vm5, %v872_v49 }
 0x315   :  { %1312 = vmatprep.subr.msk.mxu1 %vm740_vm5, %v739_v50  ;;  %1333 = vmatprep.subr.mxu0 %v871_v51 }
 0x316   :  { %1301 = vmatmul.mubr.msk.f32.gmra.mxu0 %vm198_vm1, %v488_v42  ;;  %1310 = vmatmul.mubr.msk.f32.gmra.mxu1 %vm198_vm1, %v1735_v27 }
 0x317   :  { %1313 = vmatpush3.msk.msra.mxu1 %vm740_vm5, %v739_v50  ;;  %1303 = vmatprep.mubr.msk.f32.mxu0 %vm198_vm1, %v489_v41 }
 0x318   :  { %1314 = vmatprep.subr.mxu1 %v738_v52  ;;  %1334 = vmatpush3.msra.mxu0 %v871_v51 }
 0x319   :  { %1315 = vmatpush3.msra.mxu1 %v738_v52  ;;  %1316 = vmatprep.mubr.msk.f32.mxu1 %vm35_vm0, %v1523_v2 }
 0x31a   :  { %1304 = vmatmul.mubr.msk.f32.gmra.mxu0 %vm198_vm1, %v1761_v38  ;;  %1317 = vmatmul.mubr.msk.f32.vlgmr.msra.gmra.mxu1 %vm35_vm0, %v1621_v17 }
 0x31b   :  { %1335 = vmatprep.mubr.msk.f32.mxu0 %vm35_vm0, %v1523_v2  ;;  %1319 = vmatprep.mubr.msk.f32.mxu1 %vm35_vm0, %v1607_v15  ;;  %v503_v2 = vadd.s32 56, %v1724_v10 }
 0x31d   :  { %vm515_vm6 = vcmp.eq.s32.totalorder %v503_v2, %v1726_v12 }
 0x31e   :  { %1336 = vmatmul.mubr.msk.f32.vlgmr.msra.gmra.mxu0 %vm35_vm0, %v1621_v17  ;;  %1320 = vmatmul.mubr.msk.f32.gmra.mxu1 %vm35_vm0, %v1593_v13 }
 0x31f   :  { %1338 = vmatprep.mubr.msk.f32.mxu0 %vm35_vm0, %v1607_v15  ;;  %1322 = vmatprep.mubr.msk.f32.mxu1 %vm35_vm0, %v1579_v11  ;;  %v504_v15 = vadd.s32 64, %v1724_v10 }
 0x321   :  { %vm516_vm12 = vcmp.eq.s32.totalorder %v504_v15, %v1726_v12 }
 0x322   :  { %1339 = vmatmul.mubr.msk.f32.gmra.mxu0 %vm35_vm0, %v1593_v13  ;;  %1323 = vmatmul.mubr.msk.f32.gmra.mxu1 %vm35_vm0, %v1565_v9  ;;  %v498_v13 = vadd.s32 16, %v1724_v10  ;;  %v1088_v56 = vsel %vm516_vm12, 1.0, %v1459_v16 }
 0x323   :  { %1341 = vmatprep.mubr.msk.f32.mxu0 %vm35_vm0, %v1579_v11  ;;  %1325 = vmatprep.mubr.msk.f32.mxu1 %vm35_vm0, %v1551_v7  ;;  %546 = vst.msk [vmem:[#allocation2 + $0x40] sm:$0xff] %vm198_vm1, %v1088_v56 }
 0x324   :  { %vm510_vm11 = vcmp.eq.s32.totalorder %v498_v13, %v1726_v12 }
 0x325   :  { %v1082_v55 = vsel %vm510_vm11, 1.0, %v1459_v16 }
 0x326   :  { %1342 = vmatmul.mubr.msk.f32.gmra.mxu0 %vm35_vm0, %v1565_v9  ;;  %1326 = vmatmul.mubr.msk.f32.gmra.mxu1 %vm35_vm0, %v1534_v5  ;;  %v1087_v9 = vsel %vm515_vm6, 1.0, %v1459_v16  ;;  %540 = vst.msk [vmem:[#allocation2 + $0x10] sm:$0xff] %vm198_vm1, %v1082_v55 }
 0x327   :  { %1344 = vmatprep.mubr.msk.f32.mxu0 %vm35_vm0, %v1551_v7  ;;  %1328 = vmatprep.mubr.msk.f32.mxu1 %vm35_vm0, %v1512_v1  ;;  %v502_v7 = vadd.s32 48, %v1724_v10  ;;  %545 = vst.msk [vmem:[#allocation2 + $0x38] sm:$0xff] %vm198_vm1, %v1087_v9 }
 0x329   :  { %vm514_vm8 = vcmp.eq.s32.totalorder %v502_v7, %v1726_v12 }
 0x32a   :  { %1345 = vmatmul.mubr.msk.f32.gmra.mxu0 %vm35_vm0, %v1534_v5  ;;  %1329 = vmatmul.mubr.msk.f32.gmra.mxu1 %vm35_vm0, %v1507_v0  ;;  %v505_v5 = vadd.s32 72, %v1724_v10  ;;  %v1086_v11 = vsel %vm514_vm8, 1.0, %v1459_v16 }
 0x32b   :  { %1347 = vmatprep.mubr.msk.f32.mxu0 %vm35_vm0, %v1512_v1  ;;  %v499_v1 = vadd.s32 24, %v1724_v10  ;;  %544 = vst.msk [vmem:[#allocation2 + $0x30] sm:$0xff] %vm198_vm1, %v1086_v11 }
 0x32c   :  { %vm517_vm10 = vcmp.eq.s32.totalorder %v505_v5, %v1726_v12 }
 0x32d   :  { %vm511_vm9 = vcmp.eq.s32.totalorder %v499_v1, %v1726_v12  ;;  %v1089_v53 = vsel %vm517_vm10, 1.0, %v1459_v16 }
 0x32e   :  { %1348 = vmatmul.mubr.msk.f32.gmra.mxu0 %vm35_vm0, %v1507_v0  ;;  %v1080_v0 = vsel %vm508_vm7, 1.0, %v1459_v16  ;;  %v1083_v17 = vsel %vm511_vm9, 1.0, %v1459_v16  ;;  %547 = vst.msk [vmem:[#allocation2 + $0x48] sm:$0x1f] %vm411_vm2, %v1089_v53  ;;  %vm991_vm0 = vcmask 64512  }
 0x32f   :  { %538 = vst.msk [vmem:[#allocation2] sm:$0xff] %vm198_vm1, %v1080_v0  ;;  %541 = vst.msk [vmem:[#allocation2 + $0x18] sm:$0xff] %vm198_vm1, %v1083_v17 }
 0x3d2   :  { %v1299_v60 = vpop.f32.mrf.mxu0  ;;  %v1308_v61 = vpop.f32.mrf.mxu1 }
 0x3d3   :  { %v708_v62 = vmul.f32 2.0, %v1299_v60  ;;  %v714_v63 = vmul.f32 2.0, %v1308_v61 }
 0x3d4   :  { %v658_v3 = vpop.f32.mrf.mxu0  ;;  %v688_v4 = vpop.f32.mrf.mxu1 }
 0x3d5   :  { %v718_v6 = vsub.f32 %v708_v62, %v1731_v18  ;;  %v724_v8 = vsub.f32 %v714_v63, %v1087_v9  ;;  %v707_v10 = vmul.f32 2.0, %v658_v3  ;;  %v713_v14 = vmul.f32 2.0, %v688_v4 }
 0x3d6   :  { %v1302_v19 = vpop.f32.mrf.mxu0  ;;  %v1311_v20 = vpop.f32.mrf.mxu1 }
 0x3d7   :  { %729 = vst.msk [vmem:[#allocation2 + $0xa8] sm:$0xff] %vm198_vm1, %v718_v6  ;;  %735 = vst.msk [vmem:[#allocation2 + $0xd8] sm:$0xff] %vm198_vm1, %v724_v8  ;;  %v717_v12 = vsub.f32 %v707_v10, %v1080_v0  ;;  %v723_v16 = vsub.f32 %v713_v14, %v1086_v11  ;;  %v710_v21 = vmul.f32 2.0, %v1302_v19  ;;  %v716_v22 = vmul.f32 2.0, %v1311_v20 }
 0x3d8   :  { %v668_v23 = vpop.f32.mrf.mxu0  ;;  %v698_v24 = vpop.f32.mrf.mxu1 }
 0x3d9   :  { %728 = vst.msk [vmem:[#allocation2 + $0xa0] sm:$0xff] %vm198_vm1, %v717_v12  ;;  %734 = vst.msk [vmem:[#allocation2 + $0xd0] sm:$0xff] %vm198_vm1, %v723_v16  ;;  %v720_v18 = vsub.f32 %v710_v21, %v1083_v17  ;;  %v726_v25 = vsub.f32 %v716_v22, %v1089_v53  ;;  %v709_v26 = vmul.f32 2.0, %v668_v23  ;;  %v715_v27 = vmul.f32 2.0, %v698_v24 }
 0x3da   :  { %v1305_v28 = vpop.f32.mrf.mxu0  ;;  %v1318_v29 = vpop.f32.mrf.mxu1 }
 0x3db   :  { %731 = vst.msk [vmem:[#allocation2 + $0xb8] sm:$0xff] %vm198_vm1, %v720_v18  ;;  %v719_v30 = vsub.f32 %v709_v26, %v1082_v55  ;;  %v725_v31 = vsub.f32 %v715_v27, %v1088_v56  ;;  %v712_v32 = vmul.f32 2.0, %v1305_v28 }
 0x3dc   :  { %737 = vst.msk [vmem:[#allocation2 + $0xe8] sm:$0x1f] %vm411_vm2, %v726_v25  ;;  %v678_v33 = vpop.f32.mrf.mxu0  ;;  %v810_v34 = vpop.f32.mrf.mxu1 }
 0x3dd   :  { %861 = vst.msk [vmem:[#allocation4 + $0x8] sm:$0xff] %vm859_vm15, %v1318_v29  ;;  %v722_v35 = vsub.f32 %v712_v32, %v1085_v58  ;;  %v711_v36 = vmul.f32 2.0, %v678_v33  ;;  %860 = vst.msk [vmem:[#allocation4] sm:$0xff] %vm859_vm15, %v810_v34 }
 0x3de   :  { %730 = vst.msk [vmem:[#allocation2 + $0xb0] sm:$0xff] %vm198_vm1, %v719_v30  ;;  %736 = vst.msk [vmem:[#allocation2 + $0xe0] sm:$0xff] %vm198_vm1, %v725_v31  ;;  %v1337_v37 = vpop.f32.mrf.mxu0  ;;  %v1321_v38 = vpop.f32.mrf.mxu1 }
 0x3df   :  { %733 = vst.msk [vmem:[#allocation2 + $0xc8] sm:$0xff] %vm198_vm1, %v722_v35  ;;  %v721_v39 = vsub.f32 %v711_v36, %v1084_v59 }
 0x3e0   :  { %993 = vst.msk [vmem:[%s1962_s7 + $0x8] sm:$0xff] %vm991_vm0, %v1337_v37  ;;  %v942_v40 = vpop.f32.mrf.mxu0  ;;  %v820_v41 = vpop.f32.mrf.mxu1 }
 0x3e1   :  { %863 = vst.msk [vmem:[#allocation4 + $0x18] sm:$0xff] %vm859_vm15, %v1321_v38  ;;  %862 = vst.msk [vmem:[#allocation4 + $0x10] sm:$0xff] %vm859_vm15, %v820_v41 }
 0x3e2   :  { %732 = vst.msk [vmem:[#allocation2 + $0xc0] sm:$0xff] %vm198_vm1, %v721_v39  ;;  %v1340_v42 = vpop.f32.mrf.mxu0  ;;  %v1324_v43 = vpop.f32.mrf.mxu1 }
 0x3e3   :  { %992 = vst.msk [vmem:[%s1962_s7] sm:$0xff] %vm991_vm0, %v942_v40 }
 0x3e4   :  { %1426 = shalt.err (!%p1423_p4)
}
 0x3e5   :  { %s1461_s30 = smov 128   ;;  %s1462_s8 = smov 8   ;;  %995 = vst.msk [vmem:[%s1962_s7 + $0x18] sm:$0xff] %vm991_vm0, %v1340_v42  ;;  %v952_v44 = vpop.f32.mrf.mxu0  ;;  %v830_v45 = vpop.f32.mrf.mxu1  ;;  %vm869_vm1 = vcmask 782336   ;;  %vm1001_vm2 = vcmask 61440  }
 0x3e6   :  { %1014 = dma.vmem_to_hbm [thread:$0]  %s1009_s4, 3840, %s1960_s5, [#allocation3], %s1461_s30, %s1461_s30, %s1462_s8   ;;  %865 = vst.msk [vmem:[#allocation4 + $0x28] sm:$0xff] %vm859_vm15, %v1324_v43  ;;  %864 = vst.msk [vmem:[#allocation4 + $0x20] sm:$0xff] %vm859_vm15, %v830_v45 }
 0x3e7   :  { %994 = vst.msk [vmem:[%s1962_s7 + $0x10] sm:$0xff] %vm991_vm0, %v952_v44  ;;  %v1343_v46 = vpop.f32.mrf.mxu0  ;;  %v1327_v47 = vpop.f32.mrf.mxu1  ;;  %s1463_s0 = smov [#allocation4]  }
 0x3e8   :  { %997 = vst.msk [vmem:[%s1962_s7 + $0x28] sm:$0xff] %vm991_vm0, %v1343_v46  ;;  %s1020_s16 = sshll.u32 %s1463_s0, 4  ;;  %s1021_s16 = int_to_ptr.vmem [resolvable:$true] %s1020_s16 }
 0x3e9   :  { %867 = vst.msk [vmem:[#allocation4 + $0x38] sm:$0xff] %vm859_vm15, %v1327_v47  ;;  %v962_v48 = vpop.f32.mrf.mxu0  ;;  %v840_v49 = vpop.f32.mrf.mxu1  ;;  %s1435_s21 = scalar_lea.vmem %s1021_s16, 1280  ;;  %p1440_p6 = scmp.lt.s32.totalorder %s1021_s16, %s1021_s16 }
 0x3ea   :  { %996 = vst.msk [vmem:[%s1962_s7 + $0x20] sm:$0xff] %vm991_vm0, %v962_v48  ;;  %p1436_p5 = scmp.ne.s32.totalorder %s1021_s16, %s1435_s21  ;;  %p1441_p7 = scmp.lt.s32.totalorder %s1435_s21, %s1435_s21 }
 0x3eb   :  { %866 = vst.msk [vmem:[#allocation4 + $0x30] sm:$0xff] %vm859_vm15, %v840_v49  ;;  %v1346_v50 = vpop.f32.mrf.mxu0  ;;  %v1330_v51 = vpop.f32.mrf.mxu1 }
 0x3ec   :  { %999 = vst.msk [vmem:[%s1962_s7 + $0x38] sm:$0xff] %vm991_vm0, %v1346_v50  ;;  %p1442_p8 = por %p1441_p7, %p1440_p6 }
 0x3ed   :  { %870 = vst.msk [vmem:[#allocation4 + $0x48] sm:$0x1f] %vm869_vm1, %v1330_v51  ;;  %v972_v52 = vpop.f32.mrf.mxu0  ;;  %v850_v2 = vpop.f32.mrf.mxu1 }
 0x3ee   :  { %998 = vst.msk [vmem:[%s1962_s7 + $0x30] sm:$0xff] %vm991_vm0, %v972_v52  ;;  %p1443_p9 = pnand %p1442_p8, %p1436_p5 }
 0x3ef   :  { %868 = vst.msk [vmem:[#allocation4 + $0x40] sm:$0xff] %vm859_vm15, %v850_v2  ;;  %v1349_v7 = vpop.f32.mrf.mxu0 }
 0x3f0   :  { %1446 = shalt.err (!%p1443_p9)
}
 0x3f1   :  { %1026 = dma.vmem_to_hbm [thread:$0]  %s1021_s16, 1280, %s1961_s6, [#allocation5], %s1461_s30, %s1461_s30, %s1462_s8   ;;  %v982_v9 = vpop.f32.mrf.mxu0 }
 0x3f2   :  { %1002 = vst.msk [vmem:[%s1962_s7 + $0x48] sm:$0x1f] %vm1001_vm2, %v1349_v7 }
 0x3f3   :  { %1000 = vst.msk [vmem:[%s1962_s7 + $0x40] sm:$0xff] %vm991_vm0, %v982_v9 }
 0x3f4   :  { %1455 = dma.done.wait [#allocation3], 3840  }
 0x3f5   :  { %1456 = vsyncadd [#allocation3], 4294963456 }
 0x3f6   :  { %1457 = dma.done.wait [#allocation5], 1280  }
 0x3f7   :  { %1458 = vsyncadd [#allocation5], 4294966016 }
 0x3f8   :  { %1037 = vsyncpa [#allocation3], 1 }
 0x3f9   :  { %1038 = vsyncpa [#allocation5], 1 }

</bundles_post_ra>
